<compile_context>
chip_gen: v7x
topology: tpu7x:2x2x1
jax: 0.10.0
libtpu: 0.0.40
codegen_flags: <defaults>
</compile_context>

<pallas_src>
import functools

import jax
import jax.numpy as jnp
from jax.experimental import pallas as pl
from jax.experimental.pallas import tpu as pltpu


# ----------------------------------------------------------------------------
# Kernel 1: fused backbone + decoder + head + classification_head.
#   xp   : (TM, P*Cin) bf16  -- flattened pool*pool patches (pool folded into wb)
#   wb   : (P*Cin, Cb) bf16,  bb : (1, Cb) f32
#   wd   : (Cb, Cemb) bf16,   bd : (1, Cemb) f32
#   whc  : (Cemb, K+1) bf16   -- head weights ++ classification-head weights
#   bhc  : (1, K+1) f32       -- head bias, last column = 0 (no bias on cls head)
#   out  : (TM, K+1) f32      -- [:, :K] head logits, [:, K] saliency (coarse)
# ----------------------------------------------------------------------------
def heads_kernel(xp_ref, wb_ref, bb_ref, wd_ref, bd_ref, whc_ref, bhc_ref,
                 out_ref):
    feat = jnp.dot(xp_ref[...], wb_ref[...],
                   preferred_element_type=jnp.float32)
    feat = jnp.maximum(feat + bb_ref[...], 0.0)                      # (TM, Cb)
    emb = jnp.dot(feat.astype(wd_ref.dtype), wd_ref[...],
                  preferred_element_type=jnp.float32)
    emb = jnp.maximum(emb + bd_ref[...], 0.0)                        # (TM, Cemb)
    out = jnp.dot(emb.astype(whc_ref.dtype), whc_ref[...],
                  preferred_element_type=jnp.float32)
    out_ref[...] = (out + bhc_ref[...]).astype(out_ref.dtype)


# ----------------------------------------------------------------------------
# Kernel 2: bilinear upsample of one (batch, channel) plane, NCHW output.
#   c   : (1, 1, Hs, Ws) bf16   coarse plane
#   ah  : (H, Hs) bf16          row interpolation matrix
#   awt : (Ws, W) bf16          col interpolation matrix, transposed
#   out : (1, 1, H, W) f32      lane dim = W (unmasked vst at realistic sizes)
# ----------------------------------------------------------------------------
def upsample_kernel(c_ref, ah_ref, awt_ref, out_ref):
    x = c_ref[0, 0]                                                  # (Hs, Ws)
    tmp = jnp.dot(ah_ref[...], x, preferred_element_type=jnp.float32)  # (H, Ws)
    out = jnp.dot(tmp.astype(awt_ref.dtype), awt_ref[...],
                  preferred_element_type=jnp.float32)                # (H, W)
    out_ref[0, 0] = out.astype(out_ref.dtype)


def bilinear_matrix(out_size, in_size):
    """Weights reproducing F.interpolate(mode='bilinear', align_corners=False)
    along one axis."""
    scale = in_size / out_size
    i = jnp.arange(out_size, dtype=jnp.float32)
    src = (i + 0.5) * scale - 0.5
    src = jnp.maximum(src, 0.0)
    i0 = jnp.minimum(jnp.floor(src).astype(jnp.int32), in_size - 1)
    i1 = jnp.minimum(i0 + 1, in_size - 1)
    frac = src - i0.astype(jnp.float32)
    rows = jnp.arange(out_size)
    a = jnp.zeros((out_size, in_size), jnp.float32)
    a = a.at[rows, i0].add(1.0 - frac)
    a = a.at[rows, i1].add(frac)
    return a


def _upsample_call(coarse_cm, a_h, a_wt, ch_start, ch_count, n, h, w, hs, ws):
    """Upsample channels [ch_start, ch_start+ch_count) of the channel-major
    coarse map (N, Cc, Hs, Ws) -> (N, ch_count, H, W) in NCHW."""
    cost = pl.CostEstimate(
        flops=2 * n * ch_count * (h * hs * ws + h * ws * w),
        transcendentals=0,
        bytes_accessed=n * ch_count * hs * ws * 2
        + (a_h.size + a_wt.size) * 2 + n * ch_count * h * w * 4,
    )
    return pl.pallas_call(
        upsample_kernel,
        out_shape=jax.ShapeDtypeStruct((n, ch_count, h, w), jnp.float32),
        grid=(n, ch_count),
        in_specs=[
            pl.BlockSpec((1, 1, hs, ws), lambda b, c: (b, ch_start + c, 0, 0)),
            pl.BlockSpec((h, hs), lambda b, c: (0, 0)),
            pl.BlockSpec((ws, w), lambda b, c: (0, 0)),
        ],
        out_specs=pl.BlockSpec((1, 1, h, w), lambda b, c: (b, c, 0, 0)),
        compiler_params=pltpu.CompilerParams(
            dimension_semantics=("parallel", "parallel")),
        cost_estimate=cost,
    )(coarse_cm, a_h, a_wt)


@functools.partial(jax.jit, static_argnames=('pool', 'k'))
def contrastive_segmentation_forward(x_nchw, params, *, pool=4, k=8):
    """x_nchw: (N, Cin, H, W) f32.  Returns (logits (N,K,H,W), sal.squeeze())."""
    n, cin, h, w = x_nchw.shape
    hs, ws = h // pool, w // pool
    wb, bb, wd, bd, wh, bh, wc = params
    cb, cemb = wb.shape[1], wd.shape[1]
    p = pool * pool
    cc = k + 1
    m = n * hs * ws

    # --- glue: NCHW -> (M, P*Cin) bf16 patch rows ---------------------------
    x_nhwc = jnp.transpose(x_nchw, (0, 2, 3, 1))
    xp = x_nhwc.reshape(n, hs, pool, ws, pool, cin)
    xp = jnp.transpose(xp, (0, 1, 3, 2, 4, 5)).reshape(m, p * cin)
    xp = xp.astype(jnp.bfloat16)

    # fold the pool-mean into the backbone 1x1 conv, fuse head + cls head
    wb_eff = jnp.tile(wb / p, (p, 1)).astype(jnp.bfloat16)        # (P*Cin, Cb)
    whc = jnp.concatenate([wh, wc], axis=1).astype(jnp.bfloat16)  # (Cemb, K+1)
    bhc = jnp.concatenate(
        [bh.reshape(1, k), jnp.zeros((1, 1), jnp.float32)], axis=1)

    # --- stage 1: heads, tiled/pipelined over M -----------------------------
    tm = m if m <= 1024 else 1024
    grid_m = pl.cdiv(m, tm)
    heads_cost = pl.CostEstimate(
        flops=2 * m * (p * cin * cb + cb * cemb + cemb * cc),
        transcendentals=0,
        bytes_accessed=xp.size * 2 + m * cc * 4
        + (wb_eff.size + wd.size + whc.size) * 2
        + (cb + cemb + cc) * 4,
    )
    coarse = pl.pallas_call(
        heads_kernel,
        out_shape=jax.ShapeDtypeStruct((m, cc), jnp.float32),
        grid=(grid_m,),
        in_specs=[
            pl.BlockSpec((tm, p * cin), lambda i: (i, 0)),
            pl.BlockSpec((p * cin, cb), lambda i: (0, 0)),
            pl.BlockSpec((1, cb), lambda i: (0, 0)),
            pl.BlockSpec((cb, cemb), lambda i: (0, 0)),
            pl.BlockSpec((1, cemb), lambda i: (0, 0)),
            pl.BlockSpec((cemb, cc), lambda i: (0, 0)),
            pl.BlockSpec((1, cc), lambda i: (0, 0)),
        ],
        out_specs=pl.BlockSpec((tm, cc), lambda i: (i, 0)),
        compiler_params=pltpu.CompilerParams(
            dimension_semantics=("parallel",)),
        cost_estimate=heads_cost,
    )(xp, wb_eff, bb.reshape(1, cb), wd.astype(jnp.bfloat16),
      bd.reshape(1, cemb), whc, bhc)

    # small coarse map -> channel-major (N, Cc, Hs, Ws) for the upsample stage
    coarse_cm = jnp.transpose(coarse.reshape(n, hs, ws, cc),
                              (0, 3, 1, 2)).astype(jnp.bfloat16)

    # --- stage 2: bilinear upsample, per (batch, channel), NCHW output ------
    a_h = bilinear_matrix(h, hs).astype(jnp.bfloat16)             # (H, Hs)
    a_wt = bilinear_matrix(w, ws).T.astype(jnp.bfloat16)          # (Ws, W)

    logits = _upsample_call(coarse_cm, a_h, a_wt, 0, k, n, h, w, hs, ws)
    sal = _upsample_call(coarse_cm, a_h, a_wt, k, 1, n, h, w, hs, ws)

    # matches torch's sal.squeeze() (drops the channel dim, and batch if N==1)
    sal = jnp.squeeze(sal)
    return logits, sal


def _reference(x_nchw, params, pool=4, k=8):
    """Plain-JAX f32 reference with module semantics (for correctness check)."""
    n, cin, h, w = x_nchw.shape
    hs, ws = h // pool, w // pool
    wb, bb, wd, bd, wh, bh, wc = params
    x = jnp.transpose(x_nchw, (0, 2, 3, 1))
    pooled = x.reshape(n, hs, pool, ws, pool, cin).mean(axis=(2, 4))
    feat = jax.nn.relu(pooled @ wb + bb)
    emb = jax.nn.relu(feat @ wd + bd)
    logits = emb @ wh + bh                                         # (N,Hs,Ws,K)
    sal = emb @ wc                                                 # (N,Hs,Ws,1)
    a_h = bilinear_matrix(h, hs)
    a_w = bilinear_matrix(w, ws)

    def up(t):
        t = jnp.einsum('hs,nswc->nhwc', a_h, t)
        return jnp.einsum('wt,nhtc->nhwc', a_w, t)

    logits_up = jnp.transpose(up(logits), (0, 3, 1, 2))
    sal_up = jnp.squeeze(up(sal)[..., 0])
    return logits_up, sal_up


if __name__ == "__main__":
    # small shapes: batch=2, in-channels=4, spatial=16x16
    N, CIN, H, W = 2, 4, 16, 16
    POOL, CB, CEMB, K = 4, 32, 16, 8

    key = jax.random.PRNGKey(0)
    kx, kp = jax.random.split(key)
    x = jax.random.normal(kx, (N, CIN, H, W), jnp.float32)

    pkeys = jax.random.split(kp, 7)
    params = (
        jax.random.normal(pkeys[0], (CIN, CB), jnp.float32) * 0.2,   # backbone 1x1 conv W
        jax.random.normal(pkeys[1], (CB,), jnp.float32) * 0.05,      # backbone bias
        jax.random.normal(pkeys[2], (CB, CEMB), jnp.float32) * 0.2,  # decoder 1x1 conv W
        jax.random.normal(pkeys[3], (CEMB,), jnp.float32) * 0.05,    # decoder bias
        jax.random.normal(pkeys[4], (CEMB, K), jnp.float32) * 0.2,   # head 1x1 conv W
        jax.random.normal(pkeys[5], (1, K), jnp.float32) * 0.05,     # head bias
        jax.random.normal(pkeys[6], (CEMB, 1), jnp.float32) * 0.2,   # cls head W (no bias)
    )

    logits, sal = contrastive_segmentation_forward(x, params, pool=POOL, k=K)
    jax.block_until_ready((logits, sal))

    ref_logits, ref_sal = _reference(x, params, pool=POOL, k=K)
    assert logits.shape == (N, K, H, W), logits.shape
    assert sal.shape == (N, H, W), sal.shape
    # bf16 MXU inputs (f32 accumulation) vs pure-f32 reference -> relaxed tol.
    assert jnp.allclose(logits, ref_logits, atol=5e-2, rtol=5e-2)
    assert jnp.allclose(sal, ref_sal, atol=5e-2, rtol=5e-2)

    print("KERNEL_OK")
</pallas_src>

<mosaic_0001>
module attributes {stable_mosaic.version = 11 : i64} {
  func.func private @main(%arg0: i32) attributes {dimension_semantics = [#tpu.dimension_semantics<core_parallel>], iteration_bounds = array<i64: 2>, tpu.core_type = #tpu.core_type<sc_scalar_subcore>, window_params = []} {
    return
  }
}

module attributes {stable_mosaic.version = 11 : i64} {
  func.func private @main(%arg0: i32) attributes {dimension_semantics = [#tpu.dimension_semantics<core_parallel>], iteration_bounds = array<i64: 2>, tpu.core_type = #tpu.core_type<sc_scalar_subcore>, window_params = []} {
    return
  }
}

module attributes {stable_mosaic.version = 11 : i64} {
  func.func @heads_kernel(%arg0: i32, %arg1: memref<32x64xbf16, #tpu.memory_space<vmem>>, %arg2: memref<64x32xbf16, #tpu.memory_space<vmem>>, %arg3: memref<1x32xf32, #tpu.memory_space<vmem>>, %arg4: memref<32x16xbf16, #tpu.memory_space<vmem>>, %arg5: memref<1x16xf32, #tpu.memory_space<vmem>>, %arg6: memref<16x9xbf16, #tpu.memory_space<vmem>>, %arg7: memref<1x9xf32, #tpu.memory_space<vmem>>, %arg8: memref<32x9xf32, #tpu.memory_space<vmem>>) attributes {dimension_semantics = [#tpu.dimension_semantics<parallel>], iteration_bounds = array<i64: 1>, scalar_prefetch = 0 : i64, scratch_operands = 0 : i64, tpu.core_type = #tpu.core_type<tc>, window_params = [{transform_indices = @transform_0, window_bounds = array<i64: 32, 64>}, {pipeline_mode = #tpu.pipeline_mode<synchronous>, transform_indices = @transform_1, window_bounds = array<i64: 64, 32>}, {pipeline_mode = #tpu.pipeline_mode<synchronous>, transform_indices = @transform_2, window_bounds = array<i64: 1, 32>}, {pipeline_mode = #tpu.pipeline_mode<synchronous>, transform_indices = @transform_3, window_bounds = array<i64: 32, 16>}, {pipeline_mode = #tpu.pipeline_mode<synchronous>, transform_indices = @transform_4, window_bounds = array<i64: 1, 16>}, {pipeline_mode = #tpu.pipeline_mode<synchronous>, transform_indices = @transform_5, window_bounds = array<i64: 16, 9>}, {pipeline_mode = #tpu.pipeline_mode<synchronous>, transform_indices = @transform_6, window_bounds = array<i64: 1, 9>}, {transform_indices = @transform_7, window_bounds = array<i64: 32, 9>}]} {
    %c0 = arith.constant 0 : index
    %c0_0 = arith.constant 0 : index
    %0 = vector.load %arg1[%c0, %c0_0] : memref<32x64xbf16, #tpu.memory_space<vmem>>, vector<32x64xbf16>
    %c0_1 = arith.constant 0 : index
    %c0_2 = arith.constant 0 : index
    %1 = vector.load %arg2[%c0_1, %c0_2] : memref<64x32xbf16, #tpu.memory_space<vmem>>, vector<64x32xbf16>
    %cst = arith.constant dense<0.000000e+00> : vector<32x32xf32>
    %2 = tpu.matmul %0, %1, %cst {dimension_numbers = #tpu.dot_dimension_numbers<[1], [0], [0], [1], [0, 0, 1, 1], [], []>} : vector<32x64xbf16>, vector<64x32xbf16>, vector<32x32xf32> -> vector<32x32xf32>
    %c0_3 = arith.constant 0 : index
    %c0_4 = arith.constant 0 : index
    %3 = vector.load %arg3[%c0_3, %c0_4] : memref<1x32xf32, #tpu.memory_space<vmem>>, vector<1x32xf32>
    %4 = vector.broadcast %3 : vector<1x32xf32> to vector<32x32xf32>
    %5 = arith.addf %2, %4 : vector<32x32xf32>
    %cst_5 = arith.constant 0.000000e+00 : f32
    %6 = vector.broadcast %cst_5 : f32 to vector<32x32xf32>
    %7 = arith.maximumf %5, %6 : vector<32x32xf32>
    %8 = arith.truncf %7 : vector<32x32xf32> to vector<32x32xbf16>
    %c0_6 = arith.constant 0 : index
    %c0_7 = arith.constant 0 : index
    %9 = vector.load %arg4[%c0_6, %c0_7] : memref<32x16xbf16, #tpu.memory_space<vmem>>, vector<32x16xbf16>
    %cst_8 = arith.constant dense<0.000000e+00> : vector<32x16xf32>
    %10 = tpu.matmul %8, %9, %cst_8 {dimension_numbers = #tpu.dot_dimension_numbers<[1], [0], [0], [1], [0, 0, 1, 1], [], []>} : vector<32x32xbf16>, vector<32x16xbf16>, vector<32x16xf32> -> vector<32x16xf32>
    %c0_9 = arith.constant 0 : index
    %c0_10 = arith.constant 0 : index
    %11 = vector.load %arg5[%c0_9, %c0_10] : memref<1x16xf32, #tpu.memory_space<vmem>>, vector<1x16xf32>
    %12 = vector.broadcast %11 : vector<1x16xf32> to vector<32x16xf32>
    %13 = arith.addf %10, %12 : vector<32x16xf32>
    %cst_11 = arith.constant 0.000000e+00 : f32
    %14 = vector.broadcast %cst_11 : f32 to vector<32x16xf32>
    %15 = arith.maximumf %13, %14 : vector<32x16xf32>
    %16 = arith.truncf %15 : vector<32x16xf32> to vector<32x16xbf16>
    %c0_12 = arith.constant 0 : index
    %c0_13 = arith.constant 0 : index
    %17 = vector.load %arg6[%c0_12, %c0_13] : memref<16x9xbf16, #tpu.memory_space<vmem>>, vector<16x9xbf16>
    %cst_14 = arith.constant dense<0.000000e+00> : vector<32x9xf32>
    %18 = tpu.matmul %16, %17, %cst_14 {dimension_numbers = #tpu.dot_dimension_numbers<[1], [0], [0], [1], [0, 0, 1, 1], [], []>} : vector<32x16xbf16>, vector<16x9xbf16>, vector<32x9xf32> -> vector<32x9xf32>
    %c0_15 = arith.constant 0 : index
    %c0_16 = arith.constant 0 : index
    %19 = vector.load %arg7[%c0_15, %c0_16] : memref<1x9xf32, #tpu.memory_space<vmem>>, vector<1x9xf32>
    %20 = vector.broadcast %19 : vector<1x9xf32> to vector<32x9xf32>
    %21 = arith.addf %18, %20 : vector<32x9xf32>
    %c0_17 = arith.constant 0 : index
    %c0_18 = arith.constant 0 : index
    %22 = vector.load %arg8[%c0_17, %c0_18] : memref<32x9xf32, #tpu.memory_space<vmem>>, vector<32x9xf32>
    tpu.vector_store %arg8[%c0_17, %c0_18], %21 {strides = array<i32>} : memref<32x9xf32, #tpu.memory_space<vmem>>, vector<32x9xf32>,
    return
  }
  func.func @transform_0(%arg0: i32) -> (i32, i32) {
    %c0_i32 = arith.constant 0 : i32
    %c0_i32_0 = arith.constant 0 : i32
    return %arg0, %c0_i32 : i32, i32
  }
  func.func @transform_1(%arg0: i32) -> (i32, i32) {
    %c0_i32 = arith.constant 0 : i32
    %c0_i32_0 = arith.constant 0 : i32
    %c0_i32_1 = arith.constant 0 : i32
    return %c0_i32, %c0_i32_0 : i32, i32
  }
  func.func @transform_2(%arg0: i32) -> (i32, i32) {
    %c0_i32 = arith.constant 0 : i32
    %c0_i32_0 = arith.constant 0 : i32
    %c0_i32_1 = arith.constant 0 : i32
    return %c0_i32, %c0_i32_0 : i32, i32
  }
  func.func @transform_3(%arg0: i32) -> (i32, i32) {
    %c0_i32 = arith.constant 0 : i32
    %c0_i32_0 = arith.constant 0 : i32
    %c0_i32_1 = arith.constant 0 : i32
    return %c0_i32, %c0_i32_0 : i32, i32
  }
  func.func @transform_4(%arg0: i32) -> (i32, i32) {
    %c0_i32 = arith.constant 0 : i32
    %c0_i32_0 = arith.constant 0 : i32
    %c0_i32_1 = arith.constant 0 : i32
    return %c0_i32, %c0_i32_0 : i32, i32
  }
  func.func @transform_5(%arg0: i32) -> (i32, i32) {
    %c0_i32 = arith.constant 0 : i32
    %c0_i32_0 = arith.constant 0 : i32
    %c0_i32_1 = arith.constant 0 : i32
    return %c0_i32, %c0_i32_0 : i32, i32
  }
  func.func @transform_6(%arg0: i32) -> (i32, i32) {
    %c0_i32 = arith.constant 0 : i32
    %c0_i32_0 = arith.constant 0 : i32
    %c0_i32_1 = arith.constant 0 : i32
    return %c0_i32, %c0_i32_0 : i32, i32
  }
  func.func @transform_7(%arg0: i32) -> (i32, i32) {
    %c0_i32 = arith.constant 0 : i32
    %c0_i32_0 = arith.constant 0 : i32
    return %arg0, %c0_i32 : i32, i32
  }
}

module attributes {stable_mosaic.version = 11 : i64} {
  func.func @upsample_kernel(%arg0: i32, %arg1: i32, %arg2: memref<1x1x4x4xbf16, #tpu.memory_space<vmem>>, %arg3: memref<16x4xbf16, #tpu.memory_space<vmem>>, %arg4: memref<4x16xbf16, #tpu.memory_space<vmem>>, %arg5: memref<1x1x16x16xf32, #tpu.memory_space<vmem>>) attributes {dimension_semantics = [#tpu.dimension_semantics<parallel>, #tpu.dimension_semantics<parallel>], iteration_bounds = array<i64: 2, 8>, scalar_prefetch = 0 : i64, scratch_operands = 0 : i64, tpu.core_type = #tpu.core_type<tc>, window_params = [{transform_indices = @transform_0, window_bounds = array<i64: 1, 1, 4, 4>}, {pipeline_mode = #tpu.pipeline_mode<synchronous>, transform_indices = @transform_1, window_bounds = array<i64: 16, 4>}, {pipeline_mode = #tpu.pipeline_mode<synchronous>, transform_indices = @transform_2, window_bounds = array<i64: 4, 16>}, {transform_indices = @transform_3, window_bounds = array<i64: 1, 1, 16, 16>}]} {
    %c0 = arith.constant 0 : index
    %c0_0 = arith.constant 0 : index
    %c0_1 = arith.constant 0 : index
    %c0_2 = arith.constant 0 : index
    %0 = vector.load %arg2[%c0, %c0_0, %c0_1, %c0_2] : memref<1x1x4x4xbf16, #tpu.memory_space<vmem>>, vector<1x1x4x4xbf16>
    %1 = vector.shape_cast %0 : vector<1x1x4x4xbf16> to vector<4x4xbf16>
    %c0_3 = arith.constant 0 : index
    %c0_4 = arith.constant 0 : index
    %2 = vector.load %arg3[%c0_3, %c0_4] : memref<16x4xbf16, #tpu.memory_space<vmem>>, vector<16x4xbf16>
    %cst = arith.constant dense<0.000000e+00> : vector<16x4xf32>
    %3 = tpu.matmul %2, %1, %cst {dimension_numbers = #tpu.dot_dimension_numbers<[1], [0], [0], [1], [0, 0, 1, 1], [], []>} : vector<16x4xbf16>, vector<4x4xbf16>, vector<16x4xf32> -> vector<16x4xf32>
    %4 = arith.truncf %3 : vector<16x4xf32> to vector<16x4xbf16>
    %c0_5 = arith.constant 0 : index
    %c0_6 = arith.constant 0 : index
    %5 = vector.load %arg4[%c0_5, %c0_6] : memref<4x16xbf16, #tpu.memory_space<vmem>>, vector<4x16xbf16>
    %cst_7 = arith.constant dense<0.000000e+00> : vector<16x16xf32>
    %6 = tpu.matmul %4, %5, %cst_7 {dimension_numbers = #tpu.dot_dimension_numbers<[1], [0], [0], [1], [0, 0, 1, 1], [], []>} : vector<16x4xbf16>, vector<4x16xbf16>, vector<16x16xf32> -> vector<16x16xf32>
    %c0_8 = arith.constant 0 : index
    %c0_9 = arith.constant 0 : index
    %c0_10 = arith.constant 0 : index
    %c0_11 = arith.constant 0 : index
    %7 = vector.load %arg5[%c0_8, %c0_9, %c0_10, %c0_11] : memref<1x1x16x16xf32, #tpu.memory_space<vmem>>, vector<1x1x16x16xf32>
    %8 = vector.shape_cast %7 : vector<1x1x16x16xf32> to vector<16x16xf32>
    %9 = vector.shape_cast %6 : vector<16x16xf32> to vector<1x1x16x16xf32>
    tpu.vector_store %arg5[%c0_8, %c0_9, %c0_10, %c0_11], %9 {strides = array<i32>} : memref<1x1x16x16xf32, #tpu.memory_space<vmem>>, vector<1x1x16x16xf32>,
    return
  }
  func.func @transform_0(%arg0: i32, %arg1: i32) -> (i32, i32, i32, i32) {
    %c0_i32 = arith.constant 0 : i32
    %0 = arith.addi %c0_i32, %arg1 : i32
    %c0_i32_0 = arith.constant 0 : i32
    %c0_i32_1 = arith.constant 0 : i32
    %c0_i32_2 = arith.constant 0 : i32
    return %arg0, %0, %c0_i32_0, %c0_i32_1 : i32, i32, i32, i32
  }
  func.func @transform_1(%arg0: i32, %arg1: i32) -> (i32, i32) {
    %c0_i32 = arith.constant 0 : i32
    %c0_i32_0 = arith.constant 0 : i32
    %c0_i32_1 = arith.constant 0 : i32
    return %c0_i32, %c0_i32_0 : i32, i32
  }
  func.func @transform_2(%arg0: i32, %arg1: i32) -> (i32, i32) {
    %c0_i32 = arith.constant 0 : i32
    %c0_i32_0 = arith.constant 0 : i32
    %c0_i32_1 = arith.constant 0 : i32
    return %c0_i32, %c0_i32_0 : i32, i32
  }
  func.func @transform_3(%arg0: i32, %arg1: i32) -> (i32, i32, i32, i32) {
    %c0_i32 = arith.constant 0 : i32
    %c0_i32_0 = arith.constant 0 : i32
    %c0_i32_1 = arith.constant 0 : i32
    return %arg0, %arg1, %c0_i32, %c0_i32_0 : i32, i32, i32, i32
  }
}

module attributes {stable_mosaic.version = 11 : i64} {
  func.func @upsample_kernel(%arg0: i32, %arg1: i32, %arg2: memref<1x1x4x4xbf16, #tpu.memory_space<vmem>>, %arg3: memref<16x4xbf16, #tpu.memory_space<vmem>>, %arg4: memref<4x16xbf16, #tpu.memory_space<vmem>>, %arg5: memref<1x1x16x16xf32, #tpu.memory_space<vmem>>) attributes {dimension_semantics = [#tpu.dimension_semantics<parallel>, #tpu.dimension_semantics<parallel>], iteration_bounds = array<i64: 2, 1>, scalar_prefetch = 0 : i64, scratch_operands = 0 : i64, tpu.core_type = #tpu.core_type<tc>, window_params = [{transform_indices = @transform_0, window_bounds = array<i64: 1, 1, 4, 4>}, {pipeline_mode = #tpu.pipeline_mode<synchronous>, transform_indices = @transform_1, window_bounds = array<i64: 16, 4>}, {pipeline_mode = #tpu.pipeline_mode<synchronous>, transform_indices = @transform_2, window_bounds = array<i64: 4, 16>}, {transform_indices = @transform_3, window_bounds = array<i64: 1, 1, 16, 16>}]} {
    %c0 = arith.constant 0 : index
    %c0_0 = arith.constant 0 : index
    %c0_1 = arith.constant 0 : index
    %c0_2 = arith.constant 0 : index
    %0 = vector.load %arg2[%c0, %c0_0, %c0_1, %c0_2] : memref<1x1x4x4xbf16, #tpu.memory_space<vmem>>, vector<1x1x4x4xbf16>
    %1 = vector.shape_cast %0 : vector<1x1x4x4xbf16> to vector<4x4xbf16>
    %c0_3 = arith.constant 0 : index
    %c0_4 = arith.constant 0 : index
    %2 = vector.load %arg3[%c0_3, %c0_4] : memref<16x4xbf16, #tpu.memory_space<vmem>>, vector<16x4xbf16>
    %cst = arith.constant dense<0.000000e+00> : vector<16x4xf32>
    %3 = tpu.matmul %2, %1, %cst {dimension_numbers = #tpu.dot_dimension_numbers<[1], [0], [0], [1], [0, 0, 1, 1], [], []>} : vector<16x4xbf16>, vector<4x4xbf16>, vector<16x4xf32> -> vector<16x4xf32>
    %4 = arith.truncf %3 : vector<16x4xf32> to vector<16x4xbf16>
    %c0_5 = arith.constant 0 : index
    %c0_6 = arith.constant 0 : index
    %5 = vector.load %arg4[%c0_5, %c0_6] : memref<4x16xbf16, #tpu.memory_space<vmem>>, vector<4x16xbf16>
    %cst_7 = arith.constant dense<0.000000e+00> : vector<16x16xf32>
    %6 = tpu.matmul %4, %5, %cst_7 {dimension_numbers = #tpu.dot_dimension_numbers<[1], [0], [0], [1], [0, 0, 1, 1], [], []>} : vector<16x4xbf16>, vector<4x16xbf16>, vector<16x16xf32> -> vector<16x16xf32>
    %c0_8 = arith.constant 0 : index
    %c0_9 = arith.constant 0 : index
    %c0_10 = arith.constant 0 : index
    %c0_11 = arith.constant 0 : index
    %7 = vector.load %arg5[%c0_8, %c0_9, %c0_10, %c0_11] : memref<1x1x16x16xf32, #tpu.memory_space<vmem>>, vector<1x1x16x16xf32>
    %8 = vector.shape_cast %7 : vector<1x1x16x16xf32> to vector<16x16xf32>
    %9 = vector.shape_cast %6 : vector<16x16xf32> to vector<1x1x16x16xf32>
    tpu.vector_store %arg5[%c0_8, %c0_9, %c0_10, %c0_11], %9 {strides = array<i32>} : memref<1x1x16x16xf32, #tpu.memory_space<vmem>>, vector<1x1x16x16xf32>,
    return
  }
  func.func @transform_0(%arg0: i32, %arg1: i32) -> (i32, i32, i32, i32) {
    %c8_i32 = arith.constant 8 : i32
    %0 = arith.addi %c8_i32, %arg1 : i32
    %c0_i32 = arith.constant 0 : i32
    %c0_i32_0 = arith.constant 0 : i32
    %c0_i32_1 = arith.constant 0 : i32
    return %arg0, %0, %c0_i32, %c0_i32_0 : i32, i32, i32, i32
  }
  func.func @transform_1(%arg0: i32, %arg1: i32) -> (i32, i32) {
    %c0_i32 = arith.constant 0 : i32
    %c0_i32_0 = arith.constant 0 : i32
    %c0_i32_1 = arith.constant 0 : i32
    return %c0_i32, %c0_i32_0 : i32, i32
  }
  func.func @transform_2(%arg0: i32, %arg1: i32) -> (i32, i32) {
    %c0_i32 = arith.constant 0 : i32
    %c0_i32_0 = arith.constant 0 : i32
    %c0_i32_1 = arith.constant 0 : i32
    return %c0_i32, %c0_i32_0 : i32, i32
  }
  func.func @transform_3(%arg0: i32, %arg1: i32) -> (i32, i32, i32, i32) {
    %c0_i32 = arith.constant 0 : i32
    %c0_i32_0 = arith.constant 0 : i32
    %c0_i32_1 = arith.constant 0 : i32
    return %arg0, %arg1, %c0_i32, %c0_i32_0 : i32, i32, i32, i32
  }
}

</mosaic_0001>

<bundles_post_ra>
// kernel: contrastive_segmentation_forward.4
= control target key start
LH: loop header
LB: loop body
LE: loop exit
PB: predicated region body
PF: predicated region fallthrough
CT: control target
= control target key end

     0   :  { %8 = vsyncpa [#allocation3], 0  ;;  %s778_s0 = inlined_call_operand.vmem [shape: bf16[2,9,4,4], index: 0, kind: input, shape index: {}]   ;;  %s779_s1 = inlined_call_operand.vmem [shape: bf16[16,4], index: 1, kind: input, shape index: {}]   ;;  %s780_s2 = inlined_call_operand.vmem [shape: bf16[4,16], index: 2, kind: input, shape index: {}]   ;;  %s781_s3 = inlined_call_operand.hbm [shape: f32[2,8,16,16], index: 3, kind: output, shape index: {}]  }
   0x1   :  { %10 = vsyncpa [#allocation3 + $0x1], 0  ;;  %s632_s12 = smov 0   ;;  %s634_s13 = smov 0  }
   0x2   :  { %s636_s14 = smov 0   ;;  %s638_s15 = smov 0  }
   0x3   :  { %s640_s16 = smov 0   ;;  %s642_s17 = smov 0  }
   0x4   :  { %s644_s18 = smov 0   ;;  %s646_s19 = smov 0  }
   0x5 LB: > { %s402_s20 = sadd.s32 4294967295, %s605_s19   ;;  %s403_s21 = sadd.s32 4294967294, %s605_s19   ;;  %s605_s19 = sphi %s646_s19, %s16_s19   ;;  %s601_s18 = sphi %s644_s18, %s790_s18   ;;  %s597_s17 = sphi %s642_s17, %s789_s17   ;;  %s593_s16 = sphi %s640_s16, %s788_s16   ;;  %s589_s15 = sphi %s638_s15, %s787_s15   ;;  %s585_s14 = sphi %s636_s14, %s786_s14   ;;  %s581_s13 = sphi %s634_s13, %s785_s13   ;;  %s577_s12 = sphi %s632_s12, %s784_s12  }
   0x6   : > { %s25_s22 = sadd.s32 1, %s597_s17  ;;  %s28_s23 = sadd.s32 1, %s601_s18 }
   0x7   : > { %p26_p0 = scmp.ge.s32.totalorder %s25_s22, 8  ;;  %p117_p1 = scmp.ne.s32.totalorder %s585_s14, %s581_s13 }
   0x8   : > { %p118_p2 = scmp.eq.s32.totalorder %s402_s20, 15  ;;  %p123_p5 = scmp.ne.s32.totalorder %s581_s13, %s577_s12 }
   0x9   : > { %s792_s22 = smov (%p26_p0, %s25_s22), 0  ;;  %s794_s23 = smov (!%p26_p0, %s28_s23), %s601_s18 }
   0xa   : > { %s103_s24 = ssub.s32 %s597_s17, %s792_s22  ;;  %p683_p3 = por %p118_p2, %p117_p1 }
   0xb   : > { %p30_p4 = scmp.ge.s32.totalorder %s794_s23, 2  ;;  %p124_p6 = scmp.eq.s32.totalorder %s403_s21, 15 }
   0xc   : > { %p406_p7 = scmp.ge.s32.totalorder %s605_s19, 1  ;;  %p159_p9 = scmp.lt.s32.totalorder %s605_s19, 17 }
   0xd   : > { %s796_s23 = smov (%p30_p4, %s794_s23), 0  ;;  %p692_p8 = por %p124_p6, %p123_p5 }
   0xe   : > { %s102_s27 = ssub.s32 %s601_s18, %s796_s23  ;;  %s107_s28 = sadd.s32 1, %s585_s14 }
   0xf   : > { %s104_s29 = sor.u32 %s103_s24, %s102_s27  ;;  %p160_p10 = pnand %p406_p7, %p159_p9 }
  0x10   : > { %p105_p11 = scmp.eq.s32.totalorder %s104_s29, 0  ;;  %p186_p12 = scmp.lt.s32.totalorder (!%p160_p10), %s593_s16, 1  ;;  %v607_v0 = vmov (!%p160_p10), 0.0   ;;  %vm608_vm0 = vmmov (!%p160_p10), 0   ;;  %vm207_vm1 = vcmask (!%p160_p10), 1041408   ;;  %v510_v3 = vld [vmem:[%s779_s1] sm:$0xff] (!%p160_p10)  }
  0x11   : > { %163 = sbr.rel (%p160_p10) target bundleno = 481 (0x1e1), region = 32  ;;  %p188_p13 = scmp.lt.s32.totalorder (!%p160_p10), %s589_s15, 8  ;;  %422 = vmatprep.subr.bf16.mxu0 (!%p160_p10), %v607_v0  ;;  %424 = vmatprep.mubr.msk.bf16.mxu0 (!%p160_p10), %vm608_vm0, %v607_v0  ;;  %vm203_vm2 = vcmask (!%p160_p10), 31744   ;;  %v253_v4 = vld [vmem:[%s780_s2] sm:$0x3] (!%p160_p10)  ;;  %vm301_vm3 = vcmask (!%p160_p10), 130048  }
  0x12   : > { %s701_s30 = scalar_select %p105_p11, %s585_s14, %s107_s28  }
  0x13   : > { %428 = vmatprep.subr.bf16.mxu1 (!%p160_p10), %v607_v0  ;;  %430 = vmatprep.mubr.msk.bf16.mxu1 (!%p160_p10), %vm608_vm0, %v607_v0  ;;  %v258_v5 = vsel (!%p160_p10), %vm207_vm1, %v253_v4, 0  ;;  %s183_s28 = sand.u32 (!%p160_p10), 1, %s581_s13   ;;  %s609_s21 = smov (!%p160_p10), [#allocation2]  }
  0x14   : > { %429 = vmatpush3.bf16.msra.mxu1 (!%p160_p10), %v258_v5  ;;  %s407_s29 = sshll.u32 (!%p160_p10), %s183_s28, 4  ;;  %s515_s24 = sshll.u32 (!%p160_p10), %s609_s21, 4  ;;  %s516_s24 = int_to_ptr.vmem [resolvable:$false] %s515_s24 }
  0x15   : > { %s517_s27 = scalar_lea.vmem (!%p160_p10), %s516_s24, 512 }
  0x18   : > { %s187_s4 = scalar_select %p186_p12, %s593_s16, 1 }
  0x19   : > { %s189_s5 = scalar_select %p188_p13, %s589_s15, 8 }
  0x1a   : > { %s434_s6 = smul.u32 9, %s187_s4  ;;  %s413_s4 = sshll.u32 %s589_s15, 1 }
  0x1b   : > { %s726_s15 = scalar_lea.sflag [#allocation3], %s183_s28 }
  0x1c   : > { %s191_s7 = sadd.s32 %s434_s6, %s189_s5  ;;  %s414_s5 = sshll.u32 %s593_s16, 4 }
  0x1d   : > { %s408_s8 = sshll.u32 %s191_s7, 1  ;;  %s317_s6 = sadd.s32 %s414_s5, %s413_s4 }
  0x1e   : > { %s193_s11 = scalar_lea.vmem %s778_s0, %s408_s8  ;;  %s185_s7 = scalar_lea.vmem [#allocation2], %s407_s29 }
  0x1f   : > { %v195_v1 = vld [vmem:[%s193_s11] sm:$0x3]  ;;  %s320_s8 = sshll.u32 %s185_s7, 4  ;;  %s415_s9 = sshll.u32 %s317_s6, 7  ;;  %s719_s8 = int_to_ptr.vmem [resolvable:$true] %s320_s8 }
  0x20   : > { %v209_v2 = vsel %vm207_vm1, %v195_v1, 0  ;;  %s724_s20 = scalar_lea.hbm %s781_s3, %s415_s9  ;;  %s511_s16 = scalar_lea.vmem %s719_s8, 256 }
  0x21   : > { %423 = vmatpush3.bf16.msra.mxu0 %v209_v2  ;;  %p512_p0 = scmp.ne.s32.totalorder %s719_s8, %s511_s16  ;;  %p518_p4 = scmp.lt.s32.totalorder %s719_s8, %s516_s24 }
  0x22   : > { %p519_p5 = scmp.lt.s32.totalorder %s517_s27, %s511_s16 }
  0x23   : > { %p513_p1 = pnand %p512_p0, %p683_p3 }
  0x24   : > { %425 = vmatmul.mubr.msk.bf16.vlgmr.msra.gmra.mrb[0].mxu0 %vm203_vm2, %v510_v3  ;;  %p520_p6 = por %p519_p5, %p518_p4 }
  0x25   : > { %p514_p2 = pneg %p513_p1 }
  0x27   : > { %p521_p7 = pnand %p520_p6, %p514_p2 }
  0xf7   : > { %v245_v6 = vpop.f32.mrb[0].mxu0 }
  0xf8   : > { %v426_v7 = vpop.f32.mrb[1].mxu0 }
  0xf9   : > { %v248_v8 = vpop.f32.mrb[2].mxu0 }
  0xfa   : > { %v252_v9 = vpack.c.bf16 %v248_v8, %v245_v6  ;;  %v427_v10 = vpop.f32.mrb[3].mxu0 }
  0xfc   : > { %431 = vmatmul.mubr.msk.bf16.vlgmr.msra.gmra.mrb[0].mxu1 %vm203_vm2, %v252_v9 }
 0x1cf   : > { %v294_v11 = vpop.f32.mrb[0].mxu1 }
 0x1d0   : > { %302 = vst.msk [vmem:[%s185_s7] sm:$0xff] %vm301_vm3, %v294_v11  ;;  %v432_v12 = vpop.f32.mrb[1].mxu1 }
 0x1d1   : > { %v297_v13 = vpop.f32.mrb[2].mxu1 }
 0x1d2   : > { %303 = vst.msk [vmem:[%s185_s7 + $0x8] sm:$0xff] %vm301_vm3, %v297_v13  ;;  %v433_v14 = vpop.f32.mrb[3].mxu1 }
 0x1d3   : > { %524 = shalt.err (!%p521_p7)
}
 0x1d4   : > { %s525_s28 = scalar_lea.hbm %s724_s20, 256  ;;  %s529_s5 = scalar_lea.hbm %s781_s3, 4096 }
 0x1d5   : > { %p526_p9 = scmp.ne.s32.totalorder %s724_s20, %s525_s28  ;;  %p530_p12 = scmp.lt.u32.totalorder %s724_s20, %s781_s3 }
 0x1d6   : > { %p531_p13 = scmp.lt.u32.totalorder %s529_s5, %s525_s28  ;;  %p533_p1 = scmp.lt.u32.totalorder %s525_s28, %s724_s20 }
 0x1d7   : > { %p527_p10 = pnand %p526_p9, %p683_p3 }
 0x1d8   : > { %p532_p0 = por %p531_p13, %p530_p12 }
 0x1d9   : > { %p528_p11 = pneg %p527_p10 }
 0x1da   : > { %p534_p2 = por %p533_p1, %p532_p0 }
 0x1dc   : > { %p535_p4 = pnand %p534_p2, %p528_p11 }
 0x1de   : > { %538 = shalt.err (!%p535_p4)
}
 0x1df   : > { %s610_s9 = smov 128   ;;  %s611_s10 = smov 8  }
 0x1e0   : > { %435 = dma.vmem_to_hbm [thread:$0]  (%p683_p3), %s719_s8, 256, %s724_s20, %s726_s15, %s610_s9, %s610_s9, %s611_s10  }
 0x1e1 PF: > { %p441_p5 = scmp.ge.s32.totalorder %s605_s19, 2  ;;  %s335_s11 = sand.u32 1, %s577_s12  }
 0x1e2   : > { %s336_s16 = scalar_lea.sflag [#allocation3], %s335_s11 }
 0x1e3   : > { %p438_p6 = pnand %p441_p5, %p692_p8 }
 0x1e5   : > { %572 = dma.done.wait (!%p438_p6), %s336_s16, 256  }
 0x1e6   : > { %574 = vsyncadd (!%p438_p6), %s336_s16, 4294967040  ;;  %s16_s19 = sadd.s32 1, %s605_s19   ;;  %s784_s12 = smov %s581_s13 }
 0x1e7   : > { %p13_p7 = scmp.ge.s32.totalorder %s16_s19, 18   ;;  %s785_s13 = smov %s585_s14 }
 0x1e8   : > { %s786_s14 = smov %s701_s30  ;;  %s787_s15 = smov %s597_s17 }
 0x1e9   : > { %s788_s16 = smov %s601_s18  ;;  %s789_s17 = smov %s792_s22 }
 0x1ea   : > { %s790_s18 = smov %s796_s23  ;;  %15 = sbr.rel (!%p13_p7) target bundleno = 5 (0x5), region = 67 }
 0x1f1   :  { %341 = vsyncpa [#allocation3], 1 }
 0x1f2   :  { %343 = vsyncpa [#allocation3 + $0x1], 1 }

// kernel: contrastive_segmentation_forward.3
= control target key start
LH: loop header
LB: loop body
LE: loop exit
PB: predicated region body
PF: predicated region fallthrough
CT: control target
= control target key end

     0   :  { %vm80_vm0 = vcmask 523264   ;;  %vm165_vm1 = vcmask 261120   ;;  %vm242_vm2 = vcmask 130048   ;;  %vm298_vm3 = vcmask 72704   ;;  %s461_s1 = inlined_call_operand.vmem [shape: bf16[64,32], index: 1, kind: input, shape index: {}]   ;;  %s462_s0 = inlined_call_operand.vmem [shape: bf16[32,64], index: 0, kind: input, shape index: {}]   ;;  %s463_s3 = inlined_call_operand.vmem [shape: bf16[32,16], index: 3, kind: input, shape index: {}]   ;;  %s464_s2 = inlined_call_operand.vmem [shape: f32[1,32], index: 2, kind: input, shape index: {}]   ;;  %s465_s5 = inlined_call_operand.vmem [shape: bf16[16,9], index: 5, kind: input, shape index: {}]   ;;  %s466_s4 = inlined_call_operand.vmem [shape: f32[1,16], index: 4, kind: input, shape index: {}]   ;;  %s467_s6 = inlined_call_operand.vmem [shape: f32[1,9], index: 6, kind: input, shape index: {}]   ;;  %s468_s7 = inlined_call_operand.vmem [shape: f32[32,9], index: 7, kind: output, shape index: {}]  }
   0x1   :  { %v364_v0 = vld [vmem:[%s461_s1] sm:$0xff]   ;;  %v365_v1 = vld [vmem:[%s461_s1 + $0x8] sm:$0xff]   ;;  %v366_v2 = vld [vmem:[%s461_s1 + $0x10] sm:$0xff]  }
   0x2   :  { %338 = vmatprep.subr.bf16.mxu0 %v364_v0  ;;  %v368_v3 = vld [vmem:[%s462_s0] sm:$0xff]   ;;  %v367_v4 = vld [vmem:[%s461_s1 + $0x18] sm:$0xff]   ;;  %v369_v5 = vld [vmem:[%s462_s0 + $0x8] sm:$0xff]  }
   0x3   :  { %339 = vmatpush3.bf16.msra.mxu0 %v364_v0  ;;  %346 = vmatprep.mubr.msk.bf16.mxu0 %vm80_vm0, %v368_v3  ;;  %v370_v6 = vld [vmem:[%s463_s3] sm:$0xff]   ;;  %v371_v7 = vld [vmem:[%s463_s3 + $0x8] sm:$0xff]  }
   0x4   :  { %340 = vmatprep.subr.bf16.mxu0 %v365_v1  ;;  %350 = vmatprep.subr.bf16.mxu1 %v370_v6  ;;  %v307_v8 = vld [vmem:[%s464_s2] ss:$0 sm:$0xff] }
   0x5   :  { %351 = vmatpush3.bf16.msra.mxu1 %v370_v6  ;;  %v372_v23 = vld [vmem:[%s465_s5] sm:$0xff]  }
   0x6   :  { %352 = vmatprep.subr.bf16.mxu1 %v371_v7  ;;  %v316_v24 = vld [vmem:[%s466_s4] ss:$0 sm:$0xff] }
   0x7   :  { %341 = vmatpush3.bf16.msra.mxu0 %v365_v1  ;;  %v321_v39 = vld [vmem:[%s467_s6] ss:$0 sm:$0xff] }
   0x8   :  { %342 = vmatprep.subr.bf16.mxu0 %v366_v2 }
   0x9   :  { %353 = vmatpush3.bf16.msra.mxu1 %v371_v7 }
   0xa   :  { %358 = vmatprep.subr.bf16.mxu1 %v372_v23 }
   0xb   :  { %343 = vmatpush3.bf16.msra.mxu0 %v366_v2 }
   0xc   :  { %344 = vmatprep.subr.bf16.mxu0 %v367_v4 }
   0xf   :  { %345 = vmatpush3.bf16.msra.mxu0 %v367_v4 }
  0x12   :  { %347 = vmatmul.mubr.msk.bf16.vlgmr.msra.gmra.mrb[0].mxu0 %vm80_vm0, %v369_v5 }
  0xe5   :  { %v348_v9 = vpop.f32.mrb[0].mxu0 }
  0xe6   :  { %v130_v10 = vadd.f32 %v348_v9, %v307_v8  ;;  %v121_v11 = vpop.f32.mrb[1].mxu0 }
  0xe7   :  { %v122_v12 = vadd.f32 %v307_v8, %v121_v11  ;;  %v349_v13 = vpop.f32.mrb[2].mxu0 }
  0xe8   :  { %v133_v14 = vadd.f32 %v349_v13, %v307_v8  ;;  %v124_v15 = vpop.f32.mrb[3].mxu0  ;;  %v138_v17 = vmax.f32 %v130_v10, 0.0 }
  0xe9   :  { %v125_v16 = vadd.f32 %v307_v8, %v124_v15  ;;  %v136_v19 = vmax.f32 %v122_v12, 0.0 }
  0xea   :  { %v139_v18 = vmax.f32 %v133_v14, 0.0 }
  0xeb   :  { %v137_v20 = vmax.f32 %v125_v16, 0.0 }
  0xec   :  { %v141_v21 = vpack.c.bf16 %v139_v18, %v138_v17 }
  0xed   :  { %v140_v22 = vpack.c.bf16 %v137_v20, %v136_v19 }
  0xef   :  { %354 = vmatprep.mubr.msk.bf16.mxu1 %vm165_vm1, %v140_v22 }
  0xf0   :  { %355 = vmatmul.mubr.msk.bf16.vlgmr.msra.gmra.mrb[0].mxu1 %vm165_vm1, %v141_v21 }
  0xf1   :  { %359 = vmatpush3.bf16.msra.mxu1 %v372_v23 }
 0x1c3   :  { %v356_v25 = vpop.f32.mrb[0].mxu1 }
 0x1c4   :  { %v215_v26 = vadd.f32 %v356_v25, %v316_v24  ;;  %v206_v27 = vpop.f32.mrb[1].mxu1 }
 0x1c5   :  { %v207_v28 = vadd.f32 %v316_v24, %v206_v27  ;;  %v357_v29 = vpop.f32.mrb[2].mxu1 }
 0x1c6   :  { %v218_v30 = vadd.f32 %v357_v29, %v316_v24  ;;  %v209_v31 = vpop.f32.mrb[3].mxu1  ;;  %v223_v33 = vmax.f32 %v215_v26, 0.0 }
 0x1c7   :  { %v210_v32 = vadd.f32 %v316_v24, %v209_v31  ;;  %v221_v35 = vmax.f32 %v207_v28, 0.0 }
 0x1c8   :  { %v224_v34 = vmax.f32 %v218_v30, 0.0 }
 0x1c9   :  { %v222_v36 = vmax.f32 %v210_v32, 0.0 }
 0x1ca   :  { %v226_v37 = vpack.c.bf16 %v224_v34, %v223_v33 }
 0x1cb   :  { %v225_v38 = vpack.c.bf16 %v222_v36, %v221_v35 }
 0x1cd   :  { %360 = vmatprep.mubr.msk.bf16.mxu1 %vm242_vm2, %v225_v38 }
 0x1ce   :  { %361 = vmatmul.mubr.msk.bf16.vlgmr.msra.gmra.mrb[4].mxu1 %vm242_vm2, %v226_v37 }
 0x2a1   :  { %v362_v40 = vpop.f32.mrb[4].mxu1 }
 0x2a2   :  { %v292_v41 = vadd.f32 %v362_v40, %v321_v39  ;;  %v283_v42 = vpop.f32.mrb[5].mxu1 }
 0x2a3   :  { %v284_v43 = vadd.f32 %v321_v39, %v283_v42  ;;  %v363_v44 = vpop.f32.mrb[6].mxu1 }
 0x2a4   :  { %301 = vst.msk [vmem:[%s468_s7 + $0x10] sm:$0xff] %vm298_vm3, %v292_v41  ;;  %v295_v45 = vadd.f32 %v363_v44, %v321_v39  ;;  %v286_v46 = vpop.f32.mrb[7].mxu1 }
 0x2a5   :  { %299 = vst.msk [vmem:[%s468_s7] sm:$0xff] %vm298_vm3, %v284_v43  ;;  %v287_v47 = vadd.f32 %v321_v39, %v286_v46 }
 0x2a6   :  { %302 = vst.msk [vmem:[%s468_s7 + $0x18] sm:$0xff] %vm298_vm3, %v295_v45 }
 0x2a7   :  { %300 = vst.msk [vmem:[%s468_s7 + $0x8] sm:$0xff] %vm298_vm3, %v287_v47 }

// kernel: contrastive_segmentation_forward.5
= control target key start
LH: loop header
LB: loop body
LE: loop exit
PB: predicated region body
PF: predicated region fallthrough
CT: control target
= control target key end

     0   :  { %8 = vsyncpa [#allocation3], 0  ;;  %s728_s0 = inlined_call_operand.vmem [shape: bf16[2,9,4,4], index: 0, kind: input, shape index: {}]   ;;  %s729_s1 = inlined_call_operand.vmem [shape: bf16[16,4], index: 1, kind: input, shape index: {}]   ;;  %s730_s2 = inlined_call_operand.vmem [shape: bf16[4,16], index: 2, kind: input, shape index: {}]   ;;  %s731_s3 = inlined_call_operand.hbm [shape: f32[2,1,16,16], index: 3, kind: output, shape index: {}]  }
   0x1   :  { %10 = vsyncpa [#allocation3 + $0x1], 0  ;;  %s607_s12 = smov 0   ;;  %s609_s13 = smov 0  }
   0x2   :  { %s611_s14 = smov 0   ;;  %s613_s15 = smov 0  }
   0x3   :  { %s615_s16 = smov 0   ;;  %s617_s17 = smov 0  }
   0x4 LB: > { %s406_s18 = sadd.s32 4294967295, %s580_s17   ;;  %s407_s19 = sadd.s32 4294967294, %s580_s17   ;;  %s580_s17 = sphi %s617_s17, %s16_s17   ;;  %s576_s16 = sphi %s615_s16, %s738_s16   ;;  %s572_s15 = sphi %s613_s15, %s737_s15   ;;  %s568_s14 = sphi %s611_s14, %s736_s14   ;;  %s564_s13 = sphi %s609_s13, %s735_s13   ;;  %s560_s12 = sphi %s607_s12, %s734_s12  }
   0x5   : > { %s28_s20 = sadd.s32 1, %s576_s16  ;;  %s109_s21 = sadd.s32 1, %s568_s14 }
   0x6   : > { %p30_p0 = scmp.ge.s32.totalorder %s28_s20, 2  ;;  %p119_p1 = scmp.ne.s32.totalorder %s568_s14, %s564_s13 }
   0x7   : > { %p120_p2 = scmp.eq.s32.totalorder %s406_s18, 1  ;;  %p125_p3 = scmp.ne.s32.totalorder %s564_s13, %s560_s12 }
   0x8   : > { %s740_s20 = smov (%p30_p0, %s28_s20), 0  ;;  %p126_p5 = scmp.eq.s32.totalorder %s407_s19, 1 }
   0x9   : > { %p647_p4 = por %p120_p2, %p119_p1  ;;  %s104_s23 = ssub.s32 %s576_s16, %s740_s20 }
   0xa   : > { %p410_p6 = scmp.ge.s32.totalorder %s580_s17, 1  ;;  %p107_p7 = scmp.eq.s32.totalorder %s104_s23, 0 }
   0xb   : > { %p654_p8 = por %p126_p5, %p125_p3  ;;  %p163_p9 = scmp.lt.s32.totalorder %s580_s17, 3 }
   0xc   : > { %s660_s25 = scalar_select %p107_p7, %s568_s14, %s109_s21  }
   0xd   : > { %p164_p10 = pnand %p410_p6, %p163_p9 }
   0xe   : > { %p192_p11 = scmp.lt.s32.totalorder (!%p164_p10), %s572_s15, 1  ;;  %v582_v0 = vmov (!%p164_p10), 0.0   ;;  %vm583_vm0 = vmmov (!%p164_p10), 0   ;;  %vm214_vm1 = vcmask (!%p164_p10), 1041408   ;;  %v501_v3 = vld [vmem:[%s729_s1] sm:$0xff] (!%p164_p10)   ;;  %vm210_vm2 = vcmask (!%p164_p10), 31744  }
   0xf   : > { %167 = sbr.rel (%p164_p10) target bundleno = 478 (0x1de), region = 32  ;;  %428 = vmatprep.subr.bf16.mxu0 (!%p164_p10), %v582_v0  ;;  %430 = vmatprep.mubr.msk.bf16.mxu0 (!%p164_p10), %vm583_vm0, %v582_v0  ;;  %v260_v4 = vld [vmem:[%s730_s2] sm:$0x3] (!%p164_p10)  ;;  %s188_s9 = sand.u32 (!%p164_p10), 1, %s564_s13   ;;  %vm308_vm3 = vcmask (!%p164_p10), 130048  }
  0x10   : > { %434 = vmatprep.subr.bf16.mxu1 (!%p164_p10), %v582_v0  ;;  %436 = vmatprep.mubr.msk.bf16.mxu1 (!%p164_p10), %vm583_vm0, %v582_v0  ;;  %v265_v5 = vsel (!%p164_p10), %vm214_vm1, %v260_v4, 0  ;;  %s411_s10 = sshll.u32 (!%p164_p10), %s188_s9, 4  ;;  %s423_s19 = sshll.u32 (!%p164_p10), %s572_s15, 8 }
  0x11   : > { %435 = vmatpush3.bf16.msra.mxu1 (!%p164_p10), %v265_v5  ;;  %s190_s11 = scalar_lea.vmem (!%p164_p10), [#allocation2], %s411_s10 }
  0x12   : > { %s327_s18 = sshll.u32 (!%p164_p10), %s190_s11, 4  ;;  %s675_s18 = int_to_ptr.vmem [resolvable:$true] %s327_s18 }
  0x16   : > { %s193_s26 = scalar_select %p192_p11, %s572_s15, 1 }
  0x17   : > { %s502_s15 = scalar_lea.vmem %s675_s18, 256 }
  0x18   : > { %s447_s27 = smul.u32 18, %s193_s26  ;;  %s680_s26 = scalar_lea.hbm %s731_s3, %s423_s19 }
  0x19   : > { %p503_p12 = scmp.ne.s32.totalorder %s675_s18, %s502_s15 }
  0x1a   : > { %s422_s28 = sadd.s32 16, %s447_s27  ;;  %s682_s27 = scalar_lea.sflag [#allocation3], %s188_s9 }
  0x1b   : > { %s199_s4 = scalar_lea.vmem %s728_s0, %s422_s28  ;;  %p504_p13 = pnand %p503_p12, %p647_p4 }
  0x1c   : > { %v202_v1 = vld [vmem:[%s199_s4] sm:$0x3]  ;;  %s584_s28 = smov [#allocation2]  }
  0x1d   : > { %v216_v2 = vsel %vm214_vm1, %v202_v1, 0  ;;  %p505_p0 = pneg %p504_p13  ;;  %s506_s29 = sshll.u32 %s584_s28, 4  ;;  %s507_s29 = int_to_ptr.vmem [resolvable:$false] %s506_s29 }
  0x1e   : > { %429 = vmatpush3.bf16.msra.mxu0 %v216_v2  ;;  %s508_s30 = scalar_lea.vmem %s507_s29, 512  ;;  %p509_p1 = scmp.lt.s32.totalorder %s675_s18, %s507_s29 }
  0x1f   : > { %p510_p2 = scmp.lt.s32.totalorder %s508_s30, %s502_s15 }
  0x21   : > { %431 = vmatmul.mubr.msk.bf16.vlgmr.msra.gmra.mrb[0].mxu0 %vm210_vm2, %v501_v3  ;;  %p511_p3 = por %p510_p2, %p509_p1 }
  0x23   : > { %p512_p5 = pnand %p511_p3, %p505_p0 }
  0xf4   : > { %v252_v6 = vpop.f32.mrb[0].mxu0 }
  0xf5   : > { %v432_v7 = vpop.f32.mrb[1].mxu0 }
  0xf6   : > { %v255_v8 = vpop.f32.mrb[2].mxu0 }
  0xf7   : > { %v259_v9 = vpack.c.bf16 %v255_v8, %v252_v6  ;;  %v433_v10 = vpop.f32.mrb[3].mxu0 }
  0xf9   : > { %437 = vmatmul.mubr.msk.bf16.vlgmr.msra.gmra.mrb[0].mxu1 %vm210_vm2, %v259_v9 }
 0x1cc   : > { %v301_v11 = vpop.f32.mrb[0].mxu1 }
 0x1cd   : > { %309 = vst.msk [vmem:[%s190_s11] sm:$0xff] %vm308_vm3, %v301_v11  ;;  %v438_v12 = vpop.f32.mrb[1].mxu1 }
 0x1ce   : > { %v304_v13 = vpop.f32.mrb[2].mxu1 }
 0x1cf   : > { %310 = vst.msk [vmem:[%s190_s11 + $0x8] sm:$0xff] %vm308_vm3, %v304_v13  ;;  %v439_v14 = vpop.f32.mrb[3].mxu1 }
 0x1d0   : > { %515 = shalt.err (!%p512_p5)
}
 0x1d1   : > { %s516_s4 = scalar_lea.hbm %s680_s26, 256  ;;  %s520_s7 = scalar_lea.hbm %s731_s3, 512 }
 0x1d2   : > { %p517_p6 = scmp.ne.s32.totalorder %s680_s26, %s516_s4  ;;  %p521_p10 = scmp.lt.u32.totalorder %s680_s26, %s731_s3 }
 0x1d3   : > { %p522_p11 = scmp.lt.u32.totalorder %s520_s7, %s516_s4  ;;  %p524_p13 = scmp.lt.u32.totalorder %s516_s4, %s680_s26 }
 0x1d4   : > { %p518_p7 = pnand %p517_p6, %p647_p4 }
 0x1d5   : > { %p523_p12 = por %p522_p11, %p521_p10 }
 0x1d6   : > { %p519_p9 = pneg %p518_p7 }
 0x1d7   : > { %p525_p0 = por %p524_p13, %p523_p12 }
 0x1d9   : > { %p526_p1 = pnand %p525_p0, %p519_p9 }
 0x1db   : > { %529 = shalt.err (!%p526_p1)
}
 0x1dc   : > { %s585_s10 = smov 128   ;;  %s586_s11 = smov 8  }
 0x1dd   : > { %441 = dma.vmem_to_hbm [thread:$0]  (%p647_p4), %s675_s18, 256, %s680_s26, %s682_s27, %s585_s10, %s585_s10, %s586_s11  }
 0x1de PF: > { %p448_p2 = scmp.ge.s32.totalorder %s580_s17, 2  ;;  %s342_s19 = sand.u32 1, %s560_s12  }
 0x1df   : > { %s343_s21 = scalar_lea.sflag [#allocation3], %s342_s19 }
 0x1e0   : > { %p444_p3 = pnand %p448_p2, %p654_p8 }
 0x1e2   : > { %555 = dma.done.wait (!%p444_p3), %s343_s21, 256  }
 0x1e3   : > { %557 = vsyncadd (!%p444_p3), %s343_s21, 4294967040  ;;  %s16_s17 = sadd.s32 1, %s580_s17   ;;  %s734_s12 = smov %s564_s13 }
 0x1e4   : > { %p13_p5 = scmp.ge.s32.totalorder %s16_s17, 4   ;;  %s735_s13 = smov %s568_s14 }
 0x1e5   : > { %s736_s14 = smov %s660_s25  ;;  %s737_s15 = smov %s576_s16 }
 0x1e6   : > { %s738_s16 = smov %s740_s20  ;;  %15 = sbr.rel (!%p13_p5) target bundleno = 4 (0x4), region = 67 }
 0x1ed   :  { %348 = vsyncpa [#allocation3], 1 }
 0x1ee   :  { %350 = vsyncpa [#allocation3 + $0x1], 1 }

</bundles_post_ra>
